<compile_context>
chip_gen: v6e
topology: v6e:2x2x1
jax: 0.10.0
libtpu: 0.0.40
codegen_flags: <defaults>
</compile_context>

<pallas_src>
import random

import jax
import jax.numpy as jnp
from jax.experimental import pallas as pl
from jax.experimental.pallas import tpu as pltpu

# ----------------------------- problem sizes --------------------------------
B = 2          # batch
T = 8          # sequence_length
X_DIM = 16     # x_dim
H_DIM = 32     # h_dim
GP = 128       # gate pitch: lanes reserved per gate (lane-aligned layout)

# --------------- deterministic "module __init__" randomness -----------------
random.seed(0)
SKIP_SIZE = random.randint(1, 10)
MASKS = []
for _ in range(T):
    w1 = random.randint(0, 1)
    w2 = 1 if w1 == 0 else random.randint(0, 1)
    MASKS.append((w1, w2))


def build_schedule(seq_len, skip_size, masks):
    """Replicates the Python-list (incl. negative) indexing of the reference:
         h_prev_i = masks[i][0] * originals[i] + masks[i][1] * skips[i - skip_size]
       Tokens are either "zero" or the integer index of a previous GRU output."""
    originals = ["zero"]
    skips = ["zero"] * skip_size
    sched = []
    for i in range(seq_len):
        orig_tok = originals[i]
        skip_tok = skips[i - skip_size]          # Python negative indexing preserved
        sched.append((masks[i][0], masks[i][1], orig_tok, skip_tok))
        originals.append(i)
        skips.append(i)
    return sched


SCHEDULE = build_schedule(T, SKIP_SIZE, MASKS)


# ------------------------------- Pallas kernel -------------------------------
def encoder_kernel(x_ref, w_ref, b_ref, out_ref):
    """x_ref:   (B, T, X_DIM)        raw input, no host-side relayout
       w_ref:   (X_DIM + GP, 3*GP)   rows 0..X_DIM-1 = input weights  [r|z|n],
                                     rows X_DIM..    = hidden weights [r|z|n];
                                     each gate padded to its own 128-lane slot
       b_ref:   (2, 3*GP)            row 0 = [b_ir+b_hr | b_iz+b_hz | b_in]
                                     row 1 = [0 | 0 | b_hn]   (all lane-padded)
       out_ref: (B, H_DIM)"""
    w_i = w_ref[:X_DIM, :]            # (X_DIM, 3*GP)   sublane-aligned slice
    w_h = w_ref[X_DIM:, :]            # (GP, 3*GP)      sublane-aligned slice
    b_in_fused = b_ref[0:1, :]        # (1, 3*GP)
    b_hn = b_ref[1:2, 2 * GP:]        # (1, GP)  hidden n-gate bias (inside r * .)

    # One hoisted matmul for ALL timesteps' input gates, done in the prologue:
    # (B*T, X) @ (X, 3*GP).  The (B,T,X)->(B*T,X) flatten is a layout-friendly
    # leading/sublane merge done inside the kernel (no extra XLA op).
    x2d = x_ref[...].reshape(B * T, X_DIM)
    gi_flat = jnp.dot(x2d, w_i, preferred_element_type=jnp.float32) + b_in_fused
    gi_all = gi_flat.reshape(B, T, 3 * GP)        # gi_all[b, t, :] = step-t gates

    # Hoisted broadcast (JAX does not CSE broadcast_in_dim inside the unrolled loop).
    b_hn_b = jnp.broadcast_to(b_hn, (B, GP))

    outs = []  # GRU output per timestep (traced values), unrolled at trace time

    for i in range(T):
        w1, w2, orig_tok, skip_tok = SCHEDULE[i]

        # previous hidden = W1 * original + W2 * skip, with zero terms elided
        terms = []
        if w1 and orig_tok != "zero":
            terms.append(outs[orig_tok])
        if w2 and skip_tok != "zero":
            terms.append(outs[skip_tok])
        if not terms:
            h_prev = None                       # literally zero -> specialize
        elif len(terms) == 1:
            h_prev = terms[0]
        else:
            h_prev = terms[0] + terms[1]

        gi = gi_all[:, i, :]                    # (B, 3*GP), static pick, off-chain

        if h_prev is None:
            # h_prev == 0: hidden matmul is dead; r/z hidden biases already folded.
            rz = jax.nn.sigmoid(gi[:, :2 * GP])             # lane-aligned slices
            r = rz[:, :GP]
            z = rz[:, GP:]
            n = jnp.tanh(gi[:, 2 * GP:] + r * b_hn_b)
            h_new = (1.0 - z) * n
        else:
            gh = jnp.dot(h_prev, w_h, preferred_element_type=jnp.float32)  # (B, 3*GP)
            rz = jax.nn.sigmoid(gi[:, :2 * GP] + gh[:, :2 * GP])
            r = rz[:, :GP]
            z = rz[:, GP:]
            n = jnp.tanh(gi[:, 2 * GP:] + r * (gh[:, 2 * GP:] + b_hn_b))
            h_new = (1.0 - z) * n + z * h_prev
        # NOTE: lanes [H_DIM:GP) of h_new stay exactly 0 (zero-padded weights/bias
        # => gi/gh pad = 0 => n pad = 0, z pad = 0.5, h_prev pad = 0 => h_new pad = 0).

        outs.append(h_new)

    # repeat(1,2) + chunk(2) makes original == skip == GRU output,
    # so the module returns 2 * last GRU output (real lanes only).
    out_ref[...] = 2.0 * outs[-1][:, :H_DIM]


# ----------------------------- host-side wrapper ------------------------------
_FLOPS = 2 * (B * T) * X_DIM * 3 * GP + 2 * T * B * GP * 3 * GP
_TRANSCENDENTALS = B * T * 3 * GP
_BYTES = 4 * (B * T * X_DIM + (X_DIM + GP) * 3 * GP + 2 * 3 * GP + B * H_DIM)


def encoder_forward(x, w_fused, b_fused):
    # x is passed exactly as (B, T, X_DIM): no host-side transpose/reshape op.
    vmem = pl.BlockSpec(memory_space=pltpu.MemorySpace.VMEM)
    return pl.pallas_call(
        encoder_kernel,
        out_shape=jax.ShapeDtypeStruct((B, H_DIM), jnp.float32),
        in_specs=[vmem, vmem, vmem],
        out_specs=vmem,
        compiler_params=pltpu.CompilerParams(vmem_limit_bytes=8 * 1024 * 1024),
        cost_estimate=pl.CostEstimate(
            flops=_FLOPS,
            transcendentals=_TRANSCENDENTALS,
            bytes_accessed=_BYTES,
        ),
    )(x, w_fused, b_fused)


# --------------------------- pure-JAX reference ------------------------------
def reference_forward(x, weight_ih, weight_hh, bias_ih, bias_hh):
    def gru_cell(x_i, h):
        gi = x_i @ weight_ih.T + bias_ih
        gh = h @ weight_hh.T + bias_hh
        i_r, i_z, i_n = jnp.split(gi, 3, axis=1)
        h_r, h_z, h_n = jnp.split(gh, 3, axis=1)
        r = jax.nn.sigmoid(i_r + h_r)
        z = jax.nn.sigmoid(i_z + h_z)
        n = jnp.tanh(i_n + r * h_n)
        return (1.0 - z) * n + z * h

    originals = [jnp.zeros((x.shape[0], H_DIM), jnp.float32)]
    skips = [jnp.zeros((x.shape[0], H_DIM), jnp.float32) for _ in range(SKIP_SIZE)]
    for i in range(T):
        h_prev = originals[i] * MASKS[i][0] + skips[i - SKIP_SIZE] * MASKS[i][1]
        out = gru_cell(x[:, i], h_prev)
        originals.append(out)
        skips.append(out)
    return originals[-1] + skips[-1]


# ----------------------------------- main ------------------------------------
if __name__ == "__main__":
    key = jax.random.PRNGKey(0)
    k_x, k_wih, k_whh, k_bih, k_bhh = jax.random.split(key, 5)

    # deterministic GRUCell parameters (PyTorch layout: (3*H, in), order [r, z, n])
    bound = 1.0 / (H_DIM ** 0.5)
    weight_ih = jax.random.uniform(k_wih, (3 * H_DIM, X_DIM), jnp.float32, -bound, bound)
    weight_hh = jax.random.uniform(k_whh, (3 * H_DIM, H_DIM), jnp.float32, -bound, bound)
    bias_ih = jax.random.uniform(k_bih, (3 * H_DIM,), jnp.float32, -bound, bound)
    bias_hh = jax.random.uniform(k_bhh, (3 * H_DIM,), jnp.float32, -bound, bound)

    # ----- fuse + lane-pad parameters for the kernel -----
    w_ir, w_iz, w_in = [w.T for w in jnp.split(weight_ih, 3, axis=0)]   # each (X, H)
    w_hr, w_hz, w_hn = [w.T for w in jnp.split(weight_hh, 3, axis=0)]   # each (H, H)
    b_ir, b_iz, b_in = jnp.split(bias_ih, 3)
    b_hr, b_hz, b_hn = jnp.split(bias_hh, 3)

    def pad_cols(m):         # (rows, H) -> (rows, GP)
        return jnp.pad(m, ((0, 0), (0, GP - H_DIM)))

    def pad_vec(v):          # (H,) -> (GP,)
        return jnp.pad(v, (0, GP - H_DIM))

    w_i = jnp.concatenate([pad_cols(w_ir), pad_cols(w_iz), pad_cols(w_in)], axis=1)   # (X, 3*GP)
    w_h_cat = jnp.concatenate([pad_cols(w_hr), pad_cols(w_hz), pad_cols(w_hn)], axis=1)  # (H, 3*GP)
    w_h = jnp.pad(w_h_cat, ((0, GP - H_DIM), (0, 0)))                                  # (GP, 3*GP)
    w_fused = jnp.concatenate([w_i, w_h], axis=0)                                      # (X+GP, 3*GP)

    b_row0 = jnp.concatenate([pad_vec(b_ir + b_hr), pad_vec(b_iz + b_hz), pad_vec(b_in)])   # (3*GP,)
    b_row1 = jnp.concatenate([jnp.zeros(2 * GP, jnp.float32), pad_vec(b_hn)])               # (3*GP,)
    b_fused = jnp.stack([b_row0, b_row1], axis=0)                                           # (2, 3*GP)

    x = jax.random.normal(k_x, (B, T, X_DIM), jnp.float32)

    out = encoder_forward(x, w_fused, b_fused)
    out = jax.block_until_ready(out)

    ref = reference_forward(x, weight_ih, weight_hh, bias_ih, bias_hh)
    assert out.shape == (B, H_DIM)
    assert jnp.allclose(out, ref, atol=1e-5, rtol=1e-5), "mismatch vs. reference"

    print("KERNEL_OK")
</pallas_src>

<mosaic_0001>
module attributes {stable_mosaic.version = 11 : i64} {
  func.func @encoder_kernel(%arg0: memref<2x8x16xf32, #tpu.memory_space<vmem>>, %arg1: memref<144x384xf32, #tpu.memory_space<vmem>>, %arg2: memref<2x384xf32, #tpu.memory_space<vmem>>, %arg3: memref<2x32xf32, #tpu.memory_space<vmem>>) attributes {dimension_semantics = [], scalar_prefetch = 0 : i64, scratch_operands = 0 : i64, tpu.core_type = #tpu.core_type<tc>} {
    %c0 = arith.constant 0 : index
    %c0_0 = arith.constant 0 : index
    %0 = vector.load %arg1[%c0, %c0_0] : memref<144x384xf32, #tpu.memory_space<vmem>>, vector<16x384xf32>
    %c0_1 = arith.constant 0 : index
    %c0_2 = arith.constant 0 : index
    %1 = vector.load %arg2[%c0_1, %c0_2] : memref<2x384xf32, #tpu.memory_space<vmem>>, vector<1x384xf32>
    %c1 = arith.constant 1 : index
    %c256 = arith.constant 256 : index
    %2 = vector.load %arg2[%c1, %c256] : memref<2x384xf32, #tpu.memory_space<vmem>>, vector<1x128xf32>
    %c0_3 = arith.constant 0 : index
    %c0_4 = arith.constant 0 : index
    %c0_5 = arith.constant 0 : index
    %3 = vector.load %arg0[%c0_3, %c0_4, %c0_5] : memref<2x8x16xf32, #tpu.memory_space<vmem>>, vector<2x8x16xf32>
    %4 = vector.shape_cast %3 : vector<2x8x16xf32> to vector<16x16xf32>
    %cst = arith.constant dense<0.000000e+00> : vector<16x384xf32>
    %5 = tpu.matmul %4, %0, %cst {dimension_numbers = #tpu.dot_dimension_numbers<[1], [0], [0], [1], [0, 0, 1, 1], [], []>} : vector<16x16xf32>, vector<16x384xf32>, vector<16x384xf32> -> vector<16x384xf32>
    %6 = vector.broadcast %1 : vector<1x384xf32> to vector<16x384xf32>
    %7 = arith.addf %5, %6 : vector<16x384xf32>
    %8 = vector.shape_cast %7 : vector<16x384xf32> to vector<2x8x384xf32>
    %9 = vector.shape_cast %2 : vector<1x128xf32> to vector<1x128xf32>
    %10 = vector.broadcast %9 : vector<1x128xf32> to vector<2x128xf32>
    %11 = vector.extract_strided_slice %8 {offsets = [0, 7, 0], sizes = [2, 1, 384], strides = [1, 1, 1]} : vector<2x8x384xf32> to vector<2x1x384xf32>
    %12 = vector.shape_cast %11 : vector<2x1x384xf32> to vector<2x384xf32>
    %13 = vector.extract_strided_slice %12 {offsets = [0, 0], sizes = [2, 256], strides = [1, 1]} : vector<2x384xf32> to vector<2x256xf32>
    %14 = arith.negf %13 : vector<2x256xf32>
    %15 = math.exp %14 : vector<2x256xf32>
    %cst_6 = arith.constant 1.000000e+00 : f32
    %16 = vector.broadcast %cst_6 : f32 to vector<2x256xf32>
    %17 = arith.addf %16, %15 : vector<2x256xf32>
    %18 = arith.divf %16, %17 : vector<2x256xf32>
    %19 = vector.extract_strided_slice %18 {offsets = [0, 0], sizes = [2, 128], strides = [1, 1]} : vector<2x256xf32> to vector<2x128xf32>
    %20 = vector.extract_strided_slice %18 {offsets = [0, 128], sizes = [2, 128], strides = [1, 1]} : vector<2x256xf32> to vector<2x128xf32>
    %21 = vector.extract_strided_slice %12 {offsets = [0, 256], sizes = [2, 128], strides = [1, 1]} : vector<2x384xf32> to vector<2x128xf32>
    %22 = arith.mulf %19, %10 : vector<2x128xf32>
    %23 = arith.addf %21, %22 : vector<2x128xf32>
    %24 = math.tanh %23 : vector<2x128xf32>
    %cst_7 = arith.constant 1.000000e+00 : f32
    %25 = vector.broadcast %cst_7 : f32 to vector<2x128xf32>
    %26 = arith.subf %25, %20 : vector<2x128xf32>
    %27 = arith.mulf %26, %24 : vector<2x128xf32>
    %28 = vector.extract_strided_slice %27 {offsets = [0, 0], sizes = [2, 32], strides = [1, 1]} : vector<2x128xf32> to vector<2x32xf32>
    %cst_8 = arith.constant 2.000000e+00 : f32
    %29 = vector.broadcast %cst_8 : f32 to vector<2x32xf32>
    %30 = arith.mulf %29, %28 : vector<2x32xf32>
    %c0_9 = arith.constant 0 : index
    %c0_10 = arith.constant 0 : index
    %31 = vector.load %arg3[%c0_9, %c0_10] : memref<2x32xf32, #tpu.memory_space<vmem>>, vector<2x32xf32>
    tpu.vector_store %arg3[%c0_9, %c0_10], %30 {strides = array<i32>} : memref<2x32xf32, #tpu.memory_space<vmem>>, vector<2x32xf32>,
    return
  }
}

</mosaic_0001>

<bundles_post_ra>
// kernel: tpu_custom_call.1
= control target key start
LH: loop header
LB: loop body
LE: loop exit
PB: predicated region body
PF: predicated region fallthrough
CT: control target
= control target key end

     0   :  { %8 = vsyncpa [#allocation3], 0  ;;  %s480_s0 = inlined_call_operand.hbm [shape: f32[2,8,16], index: 0, kind: input, shape index: {}]   ;;  %s481_s1 = inlined_call_operand.hbm [shape: f32[144,384], index: 1, kind: input, shape index: {}]   ;;  %s482_s2 = inlined_call_operand.hbm [shape: f32[2,384], index: 2, kind: input, shape index: {}]   ;;  %s483_s3 = inlined_call_operand.hbm [shape: f32[2,32], index: 3, kind: output, shape index: {}]  }
   0x1   :  { %9 = vsyncpa [#allocation6], 0 }
   0x2   :  { %10 = vsyncpa [#allocation4], 0  ;;  %s439_s12 = smov [#allocation5]  }
   0x3   :  { %s28_s13 = sshll.u32 %s439_s12, 4  ;;  %s29_s13 = int_to_ptr.vmem [resolvable:$true] %s28_s13 }
   0x4   :  { %s361_s14 = scalar_lea.vmem %s29_s13, 6912  ;;  %p366_p1 = scmp.lt.s32.totalorder %s29_s13, %s29_s13 }
   0x5   :  { %p362_p0 = scmp.ne.s32.totalorder %s29_s13, %s361_s14  ;;  %p367_p2 = scmp.lt.s32.totalorder %s361_s14, %s361_s14 }
   0x7   :  { %p368_p3 = por %p367_p2, %p366_p1 }
   0x9   :  { %p369_p4 = pnand %p368_p3, %p362_p0 }
   0xb   :  { %372 = shalt.err (!%p369_p4)
}
   0xc   :  { %s440_s15 = smov 384   ;;  %s441_s16 = smov 24  }
   0xd   :  { %34 = dma.hbm_to_vmem [thread:$0]  %s481_s1, 6912, %s29_s13, [#allocation6], %s440_s15, %s440_s15, %s441_s16  }
   0xe   :  { %s442_s19 = smov [#allocation2]  }
   0xf   :  { %s16_s20 = sshll.u32 %s442_s19, 4  ;;  %s17_s20 = int_to_ptr.vmem [resolvable:$true] %s16_s20 }
  0x10   :  { %s381_s21 = scalar_lea.vmem %s17_s20, 256  ;;  %p386_p6 = scmp.lt.s32.totalorder %s17_s20, %s17_s20 }
  0x11   :  { %p382_p5 = scmp.ne.s32.totalorder %s17_s20, %s381_s21  ;;  %p387_p7 = scmp.lt.s32.totalorder %s381_s21, %s381_s21 }
  0x13   :  { %p388_p8 = por %p387_p7, %p386_p6 }
  0x15   :  { %p389_p9 = pnand %p388_p8, %p382_p5 }
  0x17   :  { %392 = shalt.err (!%p389_p9)
}
  0x18   :  { %s443_s22 = smov 128   ;;  %s444_s23 = smov 8  }
  0x19   :  { %22 = dma.hbm_to_vmem [thread:$0]  %s480_s0, 256, %s17_s20, [#allocation3], %s443_s22, %s443_s22, %s444_s23  }
  0x1a   :  { %s445_s26 = smov [#allocation7]  }
  0x1b   :  { %s41_s27 = sshll.u32 %s445_s26, 4  ;;  %s42_s27 = int_to_ptr.vmem [resolvable:$true] %s41_s27 }
  0x1c   :  { %s401_s1 = scalar_lea.vmem %s42_s27, 96  ;;  %p406_p11 = scmp.lt.s32.totalorder %s42_s27, %s42_s27 }
  0x1d   :  { %p402_p10 = scmp.ne.s32.totalorder %s42_s27, %s401_s1  ;;  %p407_p12 = scmp.lt.s32.totalorder %s401_s1, %s401_s1 }
  0x1f   :  { %p408_p13 = por %p407_p12, %p406_p11 }
  0x21   :  { %p409_p0 = pnand %p408_p13, %p402_p10 }
  0x23   :  { %412 = shalt.err (!%p409_p0)
}
  0x24   :  { %44 = dma.hbm_to_vmem [thread:$0]  %s482_s2, 96, %s42_s27, [#allocation6]  }
  0x25   :  { %433 = dma.done.wait [#allocation3], 256  }
  0x26   :  { %434 = vsyncadd [#allocation3], 4294967040 }
  0x27   :  { %435 = dma.done.wait [#allocation6], 7008  }
  0x28   :  { %436 = vsyncadd [#allocation6], 4294960288  ;;  %v446_v0 = vmov 0.0   ;;  %v58_v1 = vld [vmem:[#allocation5 + $0x20] sm:$0xff]  ;;  %v57_v2 = vld [vmem:[#allocation5 + $0x18] sm:$0xff]  ;;  %vm80_vm0 = vcmask 130048   ;;  %v65_v9 = vlaneseq }
  0x29   :  { %151 = vmatprep.mubr.f32.mxu0 %v446_v0  ;;  %v55_v3 = vld [vmem:[#allocation5 + $0x8] sm:$0xff]  ;;  %115 = vmatprep.subr.mxu0 %v58_v1  ;;  %v54_v4 = vld [vmem:[#allocation5] sm:$0xff]  ;;  %v62_v5 = vld [vmem:[#allocation2] sm:$0xff]  ;;  %vm284_vm1 = vcmask 261127   ;;  %s447_s0 = smov [#allocation8]   ;;  %vm286_vm2 = vcmask 253952  }
  0x2a   :  { %116 = vmatpush1.msra.mxu0 %v57_v2  ;;  %v59_v6 = vld [vmem:[#allocation5 + $0x28] sm:$0xff]  ;;  %v56_v7 = vld [vmem:[#allocation5 + $0x10] sm:$0xff]  ;;  %321 = vmatprep.mubr.msk.f32.mxu1 %vm80_vm0, %v62_v5  ;;  %v63_v8 = vld [vmem:[#allocation2 + $0x8] sm:$0xff]  ;;  %v66_v10 = vshrl.u32 %v65_v9, 7  ;;  %s294_s2 = sshll.u32 %s447_s0, 4  ;;  %s295_s2 = int_to_ptr.vmem [resolvable:$true] %s294_s2 }
  0x2b   :  { %117 = vmatprep.subr.mxu0 %v55_v3  ;;  %317 = vmatprep.subr.mxu1 %v59_v6  ;;  %v60_v12 = vld [vmem:[#allocation7] ss:$2 sm:$0x7]  ;;  %v308_v39 = vld [vmem:[#allocation7 + $0x5] ss:$0 sm:$0xff]  ;;  %s413_s30 = scalar_lea.vmem %s295_s2, 32  ;;  %p418_p2 = scmp.lt.s32.totalorder %s295_s2, %s295_s2 }
  0x2c   :  { %118 = vmatpush1.msra.mxu0 %v54_v4  ;;  %318 = vmatpush3.msra.mxu1 %v59_v6  ;;  %v67_v11 = vsub.s32 0, %v66_v10  ;;  %v71_v14 = vsub.s32 1, %v66_v10  ;;  %v75_v32 = vsub.s32 2, %v66_v10  ;;  %p414_p1 = scmp.ne.s32.totalorder %s295_s2, %s413_s30  ;;  %p419_p3 = scmp.lt.s32.totalorder %s413_s30, %s413_s30 }
  0x2d   :  { %304 = vmatmul.mubr.msk.f32.vlgmr.msra.gmra.mxu0 %vm80_vm0, %v62_v5  ;;  %319 = vmatprep.subr.mxu1 %v56_v7 }
  0x2e   :  { %157 = vmatprep.mubr.f32.mxu0 %v446_v0  ;;  %320 = vmatpush3.msra.mxu1 %v56_v7  ;;  %v68_v13 = vrot.slane %v60_v12, %v67_v11  ;;  %v72_v19 = vrot.slane %v60_v12, %v71_v14  ;;  %v76_v35 = vrot.slane %v60_v12, %v75_v32  ;;  %p420_p4 = por %p419_p3, %p418_p2 }
  0x2f   :  { %322 = vmatmul.mubr.msk.f32.vlgmr.msra.gmra.mxu1 %vm80_vm0, %v63_v8 }
  0x30   :  { %p421_p5 = pnand %p420_p4, %p414_p1 }
  0x31   :  { %305 = vmatmul.mubr.msk.f32.gmra.mxu0 %vm80_vm0, %v63_v8 }
  0xed   :  { %v153_v15 = vpop.f32.mrf.mxu0 }
  0xee   :  { %v154_v16 = vadd.f32 %v153_v15, %v68_v13 }
  0xef   :  { %v155_v17 = vpop.f32.mrf.mxu0  ;;  %v323_v33 = vpop.f32.mrf.mxu1 }
  0xf0   :  { %v309_v18 = vmul.f32 -1.442695, %v154_v16  ;;  %v156_v22 = vadd.f32 %v155_v17, %v72_v19  ;;  %v236_v44 = vadd.f32 %v323_v33, %v76_v35 }
  0xf1   :  { %v159_v20 = vpop.f32.mrf.mxu0  ;;  %v230_v36 = vpop.f32.mrf.mxu1 }
  0xf2   :  { %333 = vpow2.f32 %v309_v18  ;;  %v160_v21 = vadd.f32 %v159_v20, %v68_v13  ;;  %v310_v26 = vmul.f32 -1.442695, %v156_v22  ;;  %v231_v40 = vadd.f32 %v230_v36, %v76_v35 }
  0xf3   :  { %v161_v24 = vpop.f32.mrf.mxu0 }
  0xf4   :  { %v311_v23 = vmul.f32 -1.442695, %v160_v21  ;;  %v162_v25 = vadd.f32 %v161_v24, %v72_v19 }
  0xf6   :  { %335 = vpow2.f32 %v311_v23  ;;  %v312_v27 = vmul.f32 -1.442695, %v162_v25 }
  0xf7   :  { %337 = vpow2.f32 %v310_v26 }
  0xf8   :  { %339 = vpow2.f32 %v312_v27 }
  0xff   :  { %v334_v28 = vpop.eup %333 }
 0x100   :  { %v255_v29 = vadd.f32 1.0, %v334_v28 }
 0x102   :  { %341 = vrcp.f32 %v255_v29 }
 0x103   :  { %v336_v30 = vpop.eup %335 }
 0x104   :  { %v257_v31 = vadd.f32 1.0, %v336_v30  ;;  %v338_v34 = vpop.eup %337 }
 0x105   :  { %v340_v37 = vpop.eup %339  ;;  %v256_v38 = vadd.f32 1.0, %v338_v34 }
 0x106   :  { %343 = vrcp.f32 %v257_v31  ;;  %v258_v42 = vadd.f32 1.0, %v340_v37 }
 0x107   :  { %345 = vrcp.f32 %v256_v38 }
 0x108   :  { %347 = vrcp.f32 %v258_v42 }
 0x10f   :  { %v342_v41 = vpop.eup %341 }
 0x110   :  { %v267_v43 = vmul.f32 %v342_v41, %v308_v39 }
 0x112   :  { %v269_v45 = vadd.f32 %v267_v43, %v231_v40 }
 0x113   :  { %v344_v46 = vpop.eup %343 }
 0x114   :  { %v268_v47 = vmul.f32 %v344_v46, %v308_v39  ;;  %349 = vtanh.f32 %v269_v45  ;;  %v346_v49 = vpop.eup %345 }
 0x115   :  { %v348_v50 = vpop.eup %347  ;;  %v273_v51 = vsub.f32 1.0, %v346_v49 }
 0x116   :  { %v270_v48 = vadd.f32 %v268_v47, %v236_v44  ;;  %v274_v54 = vsub.f32 1.0, %v348_v50 }
 0x118   :  { %351 = vtanh.f32 %v270_v48 }
 0x121   :  { %v350_v52 = vpop.eup %349 }
 0x122   :  { %v275_v53 = vmul.f32 %v350_v52, %v273_v51 }
 0x124   :  { %v277_v55 = vmul.f32 2.0, %v275_v53 }
 0x125   :  { %v352_v56 = vpop.eup %351 }
 0x126   :  { %v276_v57 = vmul.f32 %v352_v56, %v274_v54  ;;  %285 = vst.msk [vmem:[#allocation8 - $0x7] sm:$0x80] %vm284_vm1, %v277_v55 }
 0x128   :  { %v278_v58 = vmul.f32 2.0, %v276_v57 }
 0x12a   :  { %v281_v59 = vrot.slane %v278_v58, 7 }
 0x12c   :  { %287 = vst.msk [vmem:[#allocation8 + $0x1] sm:$0x1] %vm286_vm2, %v281_v59 }
 0x12d   :  { %424 = shalt.err (!%p421_p5)
}
 0x12e   :  { %297 = dma.vmem_to_hbm [thread:$0]  %s295_s2, 32, %s483_s3, [#allocation4]  }
 0x12f   :  { %437 = dma.done.wait [#allocation4], 32  }
 0x130   :  { %438 = vsyncadd [#allocation4], 4294967264 }
 0x131   :  { %301 = vsyncpa [#allocation3], 1 }
 0x132   :  { %302 = vsyncpa [#allocation6], 1 }
 0x133   :  { %303 = vsyncpa [#allocation4], 1 }

</bundles_post_ra>
